<compile_context>
chip_gen: v5e
topology: v5e:2x2
jax: 0.10.0
libtpu: 0.0.40
codegen_flags: <defaults>
</compile_context>

<pallas_src>
import jax
import jax.numpy as jnp
from jax.experimental import pallas as pl
from jax.experimental.pallas import tpu as pltpu

LANE = 128          # TPU lane width: hidden dims are padded to this.
BATCH_TILE = 4096   # max rows per grid step.


def _round_up(x, m):
    return ((x + m - 1) // m) * m


def dqn_kernel(x_ref, w1_ref, b1_ref, w2_ref, b2_ref, w3_ref, b3_ref, o_ref):
    """One batch tile of the 3-layer MLP. Weights are lane-padded; output isn't."""
    out_dim = o_ref.shape[-1]
    # In-kernel bf16 cast of the activations (free VPU work, halves MXU input width).
    x = x_ref[...].astype(jnp.bfloat16)
    # fc1 + ReLU  (bf16 MXU operands, f32 accumulation)
    h1 = jnp.dot(x, w1_ref[...], preferred_element_type=jnp.float32)
    h1 = jnp.maximum(h1 + b1_ref[...], 0.0)
    # fc2 + ReLU
    h2 = jnp.dot(h1.astype(jnp.bfloat16), w2_ref[...],
                 preferred_element_type=jnp.float32)
    h2 = jnp.maximum(h2 + b2_ref[...], 0.0)
    # fc3 (no activation). MXU result is a clean (tb, 128) tile; slice to the
    # real out_dim before the HBM store so the writeback stream is unpadded.
    out = jnp.dot(h2.astype(jnp.bfloat16), w3_ref[...],
                  preferred_element_type=jnp.float32)
    o_ref[...] = (out[:, :out_dim] + b3_ref[...]).astype(o_ref.dtype)


def prepare_params(params):
    """One-time prep: pad hidden dims to 128 lanes, cast weights to bf16.

    Padded rows/columns are zero, so they contribute exactly nothing through
    bias-add / ReLU / the next matmul.
    """
    in_dim, h1_dim = params["w1"].shape
    h2_dim = params["w2"].shape[1]
    out_dim = params["w3"].shape[1]
    h1_pad = _round_up(h1_dim, LANE)
    h2_pad = _round_up(h2_dim, LANE)
    pad_out = _round_up(out_dim, LANE)

    w1 = jnp.zeros((in_dim, h1_pad), jnp.bfloat16)
    w1 = w1.at[:, :h1_dim].set(params["w1"].astype(jnp.bfloat16))
    b1 = jnp.zeros((1, h1_pad), jnp.float32)
    b1 = b1.at[:, :h1_dim].set(params["b1"].astype(jnp.float32))

    w2 = jnp.zeros((h1_pad, h2_pad), jnp.bfloat16)
    w2 = w2.at[:h1_dim, :h2_dim].set(params["w2"].astype(jnp.bfloat16))
    b2 = jnp.zeros((1, h2_pad), jnp.float32)
    b2 = b2.at[:, :h2_dim].set(params["b2"].astype(jnp.float32))

    # fc3: input rows padded to h2_pad, output columns padded to 128 so the
    # MXU result tile is full-width; the kernel slices before storing.
    w3 = jnp.zeros((h2_pad, pad_out), jnp.bfloat16)
    w3 = w3.at[:h2_dim, :out_dim].set(params["w3"].astype(jnp.bfloat16))
    b3 = params["b3"].astype(jnp.float32).reshape(1, out_dim)

    return {
        "w1": w1, "b1": b1, "w2": w2, "b2": b2, "w3": w3, "b3": b3,
        "in_dim": in_dim, "out_dim": out_dim,
        "h1_pad": h1_pad, "h2_pad": h2_pad, "pad_out": pad_out,
    }


def dqn_forward(x, prep, *, batch_tile=BATCH_TILE):
    """x: [B, input_dim] float32; prep: output of prepare_params(params).

    Returns [B, output_dim] float32.
    """
    B, in_dim = x.shape
    assert in_dim == prep["in_dim"]
    out_dim = prep["out_dim"]
    h1_pad, h2_pad, pad_out = prep["h1_pad"], prep["h2_pad"], prep["pad_out"]

    # Batch tiling. For B <= 2*batch_tile split into >=2 steps (when B allows)
    # so the "parallel" grid axis can shard across v7x's two TensorCores.
    if B <= 2 * batch_tile:
        tb = min(batch_tile, max(16, _round_up((B + 1) // 2, 16)))
    else:
        tb = batch_tile
    padded_B = _round_up(B, tb)
    xp = x.astype(jnp.float32)
    if padded_B != B:
        xp = jnp.pad(xp, ((0, padded_B - B), (0, 0)))
    grid = (padded_B // tb,)

    flops = 2 * padded_B * (in_dim * h1_pad + h1_pad * h2_pad + h2_pad * pad_out)
    bytes_accessed = (
        padded_B * in_dim * 4            # f32 activations in
        + padded_B * out_dim * 4         # f32 unpadded output
        + prep["w1"].size * 2 + prep["w2"].size * 2 + prep["w3"].size * 2
        + prep["b1"].size * 4 + prep["b2"].size * 4 + prep["b3"].size * 4
    )

    out = pl.pallas_call(
        dqn_kernel,
        out_shape=jax.ShapeDtypeStruct((padded_B, out_dim), jnp.float32),
        grid=grid,
        in_specs=[
            # x: streamed per batch tile, f32 (cast in-kernel).
            pl.BlockSpec((tb, in_dim), lambda i: (i, 0)),
            # Parameters: grid-invariant (same block every step -> VMEM-resident).
            pl.BlockSpec((in_dim, h1_pad), lambda i: (0, 0)),
            pl.BlockSpec((1, h1_pad), lambda i: (0, 0)),
            pl.BlockSpec((h1_pad, h2_pad), lambda i: (0, 0)),
            pl.BlockSpec((1, h2_pad), lambda i: (0, 0)),
            pl.BlockSpec((h2_pad, pad_out), lambda i: (0, 0)),
            pl.BlockSpec((1, out_dim), lambda i: (0, 0)),
        ],
        out_specs=pl.BlockSpec((tb, out_dim), lambda i: (i, 0)),
        compiler_params=pltpu.CompilerParams(
            dimension_semantics=("parallel",),
            vmem_limit_bytes=32 * 1024 * 1024,  # raise v5e's 16 MiB default
        ),
        cost_estimate=pl.CostEstimate(
            flops=flops, transcendentals=0, bytes_accessed=bytes_accessed),
    )(xp, prep["w1"], prep["b1"], prep["w2"], prep["b2"], prep["w3"], prep["b3"])

    return out[:B]


def init_params(key, input_dim, output_dim):
    """Deterministic init mimicking PyTorch nn.Linear default (uniform +/- 1/sqrt(fan_in)).

    Weights are stored transposed vs PyTorch: W_i is [in_features, out_features].
    """
    dims = [(input_dim, 64), (64, 32), (32, output_dim)]
    params = {}
    for i, (fan_in, fan_out) in enumerate(dims, start=1):
        key, kw, kb = jax.random.split(key, 3)
        bound = 1.0 / jnp.sqrt(jnp.float32(fan_in))
        params[f"w{i}"] = jax.random.uniform(
            kw, (fan_in, fan_out), jnp.float32, minval=-bound, maxval=bound)
        params[f"b{i}"] = jax.random.uniform(
            kb, (1, fan_out), jnp.float32, minval=-bound, maxval=bound)
    return params


def reference_forward(x, params):
    """Pure-JAX reference mimicking the kernel's bf16-operand / f32-accumulate path."""
    w1 = params["w1"].astype(jnp.bfloat16)
    w2 = params["w2"].astype(jnp.bfloat16)
    w3 = params["w3"].astype(jnp.bfloat16)
    h1 = jnp.dot(x.astype(jnp.bfloat16), w1,
                 preferred_element_type=jnp.float32) + params["b1"]
    h1 = jnp.maximum(h1, 0.0)
    h2 = jnp.dot(h1.astype(jnp.bfloat16), w2,
                 preferred_element_type=jnp.float32) + params["b2"]
    h2 = jnp.maximum(h2, 0.0)
    return jnp.dot(h2.astype(jnp.bfloat16), w3,
                   preferred_element_type=jnp.float32) + params["b3"]


if __name__ == "__main__":
    key = jax.random.PRNGKey(0)
    key, kx, kp = jax.random.split(key, 3)

    batch = 8
    input_dim = 16
    output_dim = 4

    x = jax.random.normal(kx, (batch, input_dim), jnp.float32)
    params = init_params(kp, input_dim, output_dim)

    prep = prepare_params(params)           # once per parameter update
    out = dqn_forward(x, prep)
    out = jax.block_until_ready(out)

    ref = reference_forward(x, params)
    assert out.shape == (batch, output_dim)
    assert jnp.allclose(out, ref, atol=1e-2, rtol=1e-2), "mismatch vs reference"

    print("KERNEL_OK")
</pallas_src>

<mosaic_0001>
module attributes {stable_mosaic.version = 11 : i64} {
  func.func @dqn_kernel(%arg0: i32, %arg1: memref<16x16xf32, #tpu.memory_space<vmem>>, %arg2: memref<16x128xbf16, #tpu.memory_space<vmem>>, %arg3: memref<1x128xf32, #tpu.memory_space<vmem>>, %arg4: memref<128x128xbf16, #tpu.memory_space<vmem>>, %arg5: memref<1x128xf32, #tpu.memory_space<vmem>>, %arg6: memref<128x128xbf16, #tpu.memory_space<vmem>>, %arg7: memref<1x4xf32, #tpu.memory_space<vmem>>, %arg8: memref<16x4xf32, #tpu.memory_space<vmem>>) attributes {dimension_semantics = [#tpu.dimension_semantics<parallel>], iteration_bounds = array<i64: 1>, scalar_prefetch = 0 : i64, scratch_operands = 0 : i64, tpu.core_type = #tpu.core_type<tc>, window_params = [{transform_indices = @transform_0, window_bounds = array<i64: 16, 16>}, {pipeline_mode = #tpu.pipeline_mode<synchronous>, transform_indices = @transform_1, window_bounds = array<i64: 16, 128>}, {pipeline_mode = #tpu.pipeline_mode<synchronous>, transform_indices = @transform_2, window_bounds = array<i64: 1, 128>}, {pipeline_mode = #tpu.pipeline_mode<synchronous>, transform_indices = @transform_3, window_bounds = array<i64: 128, 128>}, {pipeline_mode = #tpu.pipeline_mode<synchronous>, transform_indices = @transform_4, window_bounds = array<i64: 1, 128>}, {pipeline_mode = #tpu.pipeline_mode<synchronous>, transform_indices = @transform_5, window_bounds = array<i64: 128, 128>}, {pipeline_mode = #tpu.pipeline_mode<synchronous>, transform_indices = @transform_6, window_bounds = array<i64: 1, 4>}, {transform_indices = @transform_7, window_bounds = array<i64: 16, 4>}]} {
    %c0 = arith.constant 0 : index
    %c0_0 = arith.constant 0 : index
    %0 = vector.load %arg1[%c0, %c0_0] : memref<16x16xf32, #tpu.memory_space<vmem>>, vector<16x16xf32>
    %1 = arith.truncf %0 : vector<16x16xf32> to vector<16x16xbf16>
    %c0_1 = arith.constant 0 : index
    %c0_2 = arith.constant 0 : index
    %2 = vector.load %arg2[%c0_1, %c0_2] : memref<16x128xbf16, #tpu.memory_space<vmem>>, vector<16x128xbf16>
    %cst = arith.constant dense<0.000000e+00> : vector<16x128xf32>
    %3 = tpu.matmul %1, %2, %cst {dimension_numbers = #tpu.dot_dimension_numbers<[1], [0], [0], [1], [0, 0, 1, 1], [], []>} : vector<16x16xbf16>, vector<16x128xbf16>, vector<16x128xf32> -> vector<16x128xf32>
    %c0_3 = arith.constant 0 : index
    %c0_4 = arith.constant 0 : index
    %4 = vector.load %arg3[%c0_3, %c0_4] : memref<1x128xf32, #tpu.memory_space<vmem>>, vector<1x128xf32>
    %5 = vector.broadcast %4 : vector<1x128xf32> to vector<16x128xf32>
    %6 = arith.addf %3, %5 : vector<16x128xf32>
    %cst_5 = arith.constant 0.000000e+00 : f32
    %7 = vector.broadcast %cst_5 : f32 to vector<16x128xf32>
    %8 = arith.maximumf %6, %7 : vector<16x128xf32>
    %9 = arith.truncf %8 : vector<16x128xf32> to vector<16x128xbf16>
    %c0_6 = arith.constant 0 : index
    %c0_7 = arith.constant 0 : index
    %10 = vector.load %arg4[%c0_6, %c0_7] : memref<128x128xbf16, #tpu.memory_space<vmem>>, vector<128x128xbf16>
    %cst_8 = arith.constant dense<0.000000e+00> : vector<16x128xf32>
    %11 = tpu.matmul %9, %10, %cst_8 {dimension_numbers = #tpu.dot_dimension_numbers<[1], [0], [0], [1], [0, 0, 1, 1], [], []>} : vector<16x128xbf16>, vector<128x128xbf16>, vector<16x128xf32> -> vector<16x128xf32>
    %c0_9 = arith.constant 0 : index
    %c0_10 = arith.constant 0 : index
    %12 = vector.load %arg5[%c0_9, %c0_10] : memref<1x128xf32, #tpu.memory_space<vmem>>, vector<1x128xf32>
    %13 = vector.broadcast %12 : vector<1x128xf32> to vector<16x128xf32>
    %14 = arith.addf %11, %13 : vector<16x128xf32>
    %cst_11 = arith.constant 0.000000e+00 : f32
    %15 = vector.broadcast %cst_11 : f32 to vector<16x128xf32>
    %16 = arith.maximumf %14, %15 : vector<16x128xf32>
    %17 = arith.truncf %16 : vector<16x128xf32> to vector<16x128xbf16>
    %c0_12 = arith.constant 0 : index
    %c0_13 = arith.constant 0 : index
    %18 = vector.load %arg6[%c0_12, %c0_13] : memref<128x128xbf16, #tpu.memory_space<vmem>>, vector<128x128xbf16>
    %cst_14 = arith.constant dense<0.000000e+00> : vector<16x128xf32>
    %19 = tpu.matmul %17, %18, %cst_14 {dimension_numbers = #tpu.dot_dimension_numbers<[1], [0], [0], [1], [0, 0, 1, 1], [], []>} : vector<16x128xbf16>, vector<128x128xbf16>, vector<16x128xf32> -> vector<16x128xf32>
    %20 = vector.extract_strided_slice %19 {offsets = [0, 0], sizes = [16, 4], strides = [1, 1]} : vector<16x128xf32> to vector<16x4xf32>
    %c0_15 = arith.constant 0 : index
    %c0_16 = arith.constant 0 : index
    %21 = vector.load %arg7[%c0_15, %c0_16] : memref<1x4xf32, #tpu.memory_space<vmem>>, vector<1x4xf32>
    %22 = vector.broadcast %21 : vector<1x4xf32> to vector<16x4xf32>
    %23 = arith.addf %20, %22 : vector<16x4xf32>
    %c0_17 = arith.constant 0 : index
    %c0_18 = arith.constant 0 : index
    %24 = vector.load %arg8[%c0_17, %c0_18] : memref<16x4xf32, #tpu.memory_space<vmem>>, vector<16x4xf32>
    tpu.vector_store %arg8[%c0_17, %c0_18], %23 {strides = array<i32>} : memref<16x4xf32, #tpu.memory_space<vmem>>, vector<16x4xf32>,
    return
  }
  func.func @transform_0(%arg0: i32) -> (i32, i32) {
    %c0_i32 = arith.constant 0 : i32
    %c0_i32_0 = arith.constant 0 : i32
    return %arg0, %c0_i32 : i32, i32
  }
  func.func @transform_1(%arg0: i32) -> (i32, i32) {
    %c0_i32 = arith.constant 0 : i32
    %c0_i32_0 = arith.constant 0 : i32
    %c0_i32_1 = arith.constant 0 : i32
    return %c0_i32, %c0_i32_0 : i32, i32
  }
  func.func @transform_2(%arg0: i32) -> (i32, i32) {
    %c0_i32 = arith.constant 0 : i32
    %c0_i32_0 = arith.constant 0 : i32
    %c0_i32_1 = arith.constant 0 : i32
    return %c0_i32, %c0_i32_0 : i32, i32
  }
  func.func @transform_3(%arg0: i32) -> (i32, i32) {
    %c0_i32 = arith.constant 0 : i32
    %c0_i32_0 = arith.constant 0 : i32
    %c0_i32_1 = arith.constant 0 : i32
    return %c0_i32, %c0_i32_0 : i32, i32
  }
  func.func @transform_4(%arg0: i32) -> (i32, i32) {
    %c0_i32 = arith.constant 0 : i32
    %c0_i32_0 = arith.constant 0 : i32
    %c0_i32_1 = arith.constant 0 : i32
    return %c0_i32, %c0_i32_0 : i32, i32
  }
  func.func @transform_5(%arg0: i32) -> (i32, i32) {
    %c0_i32 = arith.constant 0 : i32
    %c0_i32_0 = arith.constant 0 : i32
    %c0_i32_1 = arith.constant 0 : i32
    return %c0_i32, %c0_i32_0 : i32, i32
  }
  func.func @transform_6(%arg0: i32) -> (i32, i32) {
    %c0_i32 = arith.constant 0 : i32
    %c0_i32_0 = arith.constant 0 : i32
    %c0_i32_1 = arith.constant 0 : i32
    return %c0_i32, %c0_i32_0 : i32, i32
  }
  func.func @transform_7(%arg0: i32) -> (i32, i32) {
    %c0_i32 = arith.constant 0 : i32
    %c0_i32_0 = arith.constant 0 : i32
    return %arg0, %c0_i32 : i32, i32
  }
}

</mosaic_0001>

<bundles_post_ra>
// kernel: tpu_custom_call.1
= control target key start
LH: loop header
LB: loop body
LE: loop exit
PB: predicated region body
PF: predicated region fallthrough
CT: control target
= control target key end

     0   :  { %12 = vsyncpa [#allocation3], 0  ;;  %s579_s0 = inlined_call_operand.hbm [shape: f32[16,16], index: 0, kind: input, shape index: {}]   ;;  %s580_s1 = inlined_call_operand.hbm [shape: bf16[16,128], index: 1, kind: input, shape index: {}]   ;;  %s581_s2 = inlined_call_operand.vmem [shape: f32[1,128], index: 2, kind: input, shape index: {}]   ;;  %s582_s3 = inlined_call_operand.hbm [shape: bf16[128,128], index: 3, kind: input, shape index: {}]   ;;  %s583_s4 = inlined_call_operand.vmem [shape: f32[1,128], index: 4, kind: input, shape index: {}]   ;;  %s584_s5 = inlined_call_operand.hbm [shape: bf16[128,128], index: 5, kind: input, shape index: {}]   ;;  %s585_s6 = inlined_call_operand.vmem [shape: f32[1,4], index: 6, kind: input, shape index: {}]   ;;  %s586_s7 = inlined_call_operand.vmem [shape: f32[16,4], index: 7, kind: output, shape index: {}]  }
   0x1   :  { %13 = vsyncpa [#allocation5], 0  ;;  %s32_s26 = sshll.u32 %s580_s1, 4  ;;  %s33_s26 = int_to_ptr.hbm [resolvable:$true] %s32_s26 }
   0x2   :  { %14 = vsyncpa [#allocation8], 0  ;;  %s504_s27 = smov [#allocation4]   ;;  %s19_s8 = sshll.u32 %s579_s0, 4  ;;  %s20_s8 = int_to_ptr.hbm [resolvable:$true] %s19_s8 }
   0x3   :  { %s34_s28 = sshll.u32 %s504_s27, 4  ;;  %s505_s9 = smov 64   ;;  %s35_s28 = int_to_ptr.vmem [resolvable:$true] %s34_s28 }
   0x4   :  { %s506_s10 = smov 4   ;;  %s507_s11 = smov [#allocation2]  }
   0x5   :  { %40 = dma.hbm_to_vmem [thread:$0]  %s33_s26, 128, %s35_s28, [#allocation5], %s505_s9, %s505_s9, %s506_s10  }
   0x6   :  { %s21_s12 = sshll.u32 %s507_s11, 4  ;;  %s508_s13 = smov 128   ;;  %s22_s12 = int_to_ptr.vmem [resolvable:$true] %s21_s12 }
   0x7   :  { %s509_s14 = smov 8   ;;  %s47_s16 = sshll.u32 %s582_s3, 4  ;;  %s48_s16 = int_to_ptr.hbm [resolvable:$true] %s47_s16 }
   0x8   :  { %27 = dma.hbm_to_vmem [thread:$0]  %s20_s8, 256, %s22_s12, [#allocation3], %s508_s13, %s508_s13, %s509_s14  }
   0x9   :  { %s510_s17 = smov [#allocation6]   ;;  %s62_s20 = sshll.u32 %s584_s5, 4  ;;  %s63_s20 = int_to_ptr.hbm [resolvable:$true] %s62_s20 }
   0xa   :  { %s49_s18 = sshll.u32 %s510_s17, 4  ;;  %s511_s21 = smov [#allocation7]   ;;  %s50_s18 = int_to_ptr.vmem [resolvable:$true] %s49_s18 }
   0xb   :  { %55 = dma.hbm_to_vmem [thread:$0]  %s48_s16, 1024, %s50_s18, [#allocation5], %s505_s9, %s505_s9, %s506_s10  }
   0xc   :  { %s64_s22 = sshll.u32 %s511_s21, 4  ;;  %s65_s22 = int_to_ptr.vmem [resolvable:$true] %s64_s22 }
   0xd   :  { %70 = dma.hbm_to_vmem [thread:$0]  %s63_s20, 1024, %s65_s22, [#allocation8], %s505_s9, %s505_s9, %s506_s10  }
   0xe   :  { %498 = dma.done.wait [#allocation3], 256  }
   0xf   :  { %499 = vsyncadd [#allocation3], 4294967040 }
  0x10   :  { %500 = dma.done.wait [#allocation5], 1152  }
  0x11   :  { %501 = vsyncadd [#allocation5], 4294966144 }
  0x12   :  { %502 = dma.done.wait [#allocation8], 1024  }
  0x13   :  { %503 = vsyncadd [#allocation8], 4294966272  ;;  %v374_v0 = vld [vmem:[#allocation4] sm:$0xff]  ;;  %v90_v1 = vld [vmem:[#allocation2] sm:$0xff]  ;;  %vm105_vm0 = vcmask 130048   ;;  %vm295_vm1 = vcmask 31744  }
  0x14   :  { %v91_v2 = vld [vmem:[#allocation2 + $0x8] sm:$0xff]  ;;  %v382_v4 = vld [vmem:[#allocation6 + $0x38] sm:$0xff]  ;;  %116 = vmatpush.bf16.msra.mxu0 %v374_v0  ;;  %v380_v6 = vld [vmem:[#allocation6 + $0x28] sm:$0xff] }
  0x15   :  { %v92_v3 = vpack.c.bf16 %v91_v2, %v90_v1  ;;  %194 = vmatpush.bf16.msra.mxu1 %v382_v4  ;;  %v381_v5 = vld [vmem:[#allocation6 + $0x30] sm:$0xff]  ;;  %v379_v7 = vld [vmem:[#allocation6 + $0x20] sm:$0xff]  ;;  %v378_v8 = vld [vmem:[#allocation6 + $0x18] sm:$0xff] }
  0x16   :  { %v377_v9 = vld [vmem:[#allocation6 + $0x10] sm:$0xff]  ;;  %v376_v10 = vld [vmem:[#allocation6 + $0x8] sm:$0xff]  ;;  %v375_v11 = vld [vmem:[#allocation6] sm:$0xff] }
  0x17   :  { %309 = vmatmul.msk.bf16.vlgmr.msra.gmra.mxu0 %vm105_vm0, %v92_v3  ;;  %v390_v12 = vld [vmem:[#allocation7 + $0x38] sm:$0xff]  ;;  %v389_v13 = vld [vmem:[#allocation7 + $0x30] sm:$0xff]  ;;  %v388_v14 = vld [vmem:[#allocation7 + $0x28] sm:$0xff] }
  0x18   :  { %275 = vmatpush.bf16.msra.mxu2 %v390_v12  ;;  %v387_v15 = vld [vmem:[#allocation7 + $0x20] sm:$0xff]  ;;  %v399_v17 = vld [vmem:[%s581_s2] ss:$0 sm:$0xff]  ;;  %v386_v24 = vld [vmem:[#allocation7 + $0x18] sm:$0xff] }
  0x19   :  { %195 = vmatpush.bf16.msra.mxu1 %v381_v5  ;;  %v385_v25 = vld [vmem:[#allocation7 + $0x10] sm:$0xff]  ;;  %v384_v26 = vld [vmem:[#allocation7 + $0x8] sm:$0xff]  ;;  %v383_v27 = vld [vmem:[#allocation7] sm:$0xff] }
  0x1a   :  { %v400_v29 = vld [vmem:[%s583_s4] ss:$0 sm:$0xff] }
  0x1b   :  { %v401_v36 = vld [vmem:[%s585_s6] ss:$0 sm:$0xff] }
  0x1c   :  { %276 = vmatpush.bf16.msra.mxu2 %v389_v13 }
  0x1d   :  { %196 = vmatpush.bf16.msra.mxu1 %v380_v6 }
  0x20   :  { %277 = vmatpush.bf16.msra.mxu2 %v388_v14 }
  0x21   :  { %197 = vmatpush.bf16.msra.mxu1 %v379_v7 }
  0x24   :  { %278 = vmatpush.bf16.msra.mxu2 %v387_v15 }
  0x25   :  { %198 = vmatpush.bf16.msra.mxu1 %v378_v8 }
  0x28   :  { %279 = vmatpush.bf16.msra.mxu2 %v386_v24 }
  0x29   :  { %199 = vmatpush.bf16.msra.mxu1 %v377_v9 }
  0x2c   :  { %280 = vmatpush.bf16.msra.mxu2 %v385_v25 }
  0x2d   :  { %200 = vmatpush.bf16.msra.mxu1 %v376_v10 }
  0x30   :  { %281 = vmatpush.bf16.msra.mxu2 %v384_v26 }
  0x31   :  { %201 = vmatpush.bf16.msra.mxu1 %v375_v11 }
  0x34   :  { %282 = vmatpush.bf16.msra.mxu2 %v383_v27 }
  0x94   :  { %v118_v16 = vpop.f32.mrf.mxu0 }
  0x95   :  { %v119_v18 = vadd.f32 %v399_v17, %v118_v16 }
  0x97   :  { %v123_v21 = vmax.f32 %v119_v18, 0.0 }
  0x9c   :  { %v120_v19 = vpop.f32.mrf.mxu0 }
  0x9d   :  { %v121_v20 = vadd.f32 %v399_v17, %v120_v19 }
  0x9f   :  { %v124_v22 = vmax.f32 %v121_v20, 0.0 }
  0xa1   :  { %v125_v23 = vpack.c.bf16 %v124_v22, %v123_v21 }
  0xa3   :  { %202 = vmatmul.bf16.vlgmr.msra.gmra.mxu1 %v125_v23 }
 0x120   :  { %v203_v28 = vpop.f32.mrf.mxu1 }
 0x121   :  { %v204_v30 = vadd.f32 %v400_v29, %v203_v28 }
 0x123   :  { %v208_v33 = vmax.f32 %v204_v30, 0.0 }
 0x128   :  { %v205_v31 = vpop.f32.mrf.mxu1 }
 0x129   :  { %v206_v32 = vadd.f32 %v400_v29, %v205_v31 }
 0x12b   :  { %v209_v34 = vmax.f32 %v206_v32, 0.0 }
 0x12d   :  { %v210_v35 = vpack.c.bf16 %v209_v34, %v208_v33 }
 0x12f   :  { %283 = vmatmul.bf16.vlgmr.msra.gmra.mxu2 %v210_v35 }
 0x1b2   :  { %v284_v37 = vpop.f32.mrf.mxu2 }
 0x1b3   :  { %v293_v38 = vadd.f32 %v401_v36, %v284_v37 }
 0x1b5   :  { %296 = vst.msk [vmem:[%s586_s7] sm:$0xff] %vm295_vm1, %v293_v38 }
 0x1ba   :  { %v286_v39 = vpop.f32.mrf.mxu2 }
 0x1bb   :  { %v294_v40 = vadd.f32 %v401_v36, %v286_v39 }
 0x1bd   :  { %297 = vst.msk [vmem:[%s586_s7 + $0x8] sm:$0xff] %vm295_vm1, %v294_v40 }
 0x1be   :  { %302 = vsyncpa [#allocation3], 1 }
 0x1bf   :  { %303 = vsyncpa [#allocation5], 1 }
 0x1c0   :  { %304 = vsyncpa [#allocation8], 1 }

</bundles_post_ra>
